<compile_context>
chip_gen: v7x
topology: tpu7x:2x2x1
jax: 0.10.0
libtpu: 0.0.40
codegen_flags: <defaults>
</compile_context>

<pallas_src>
import functools

import jax
import jax.numpy as jnp
from jax.experimental import pallas as pl
from jax.experimental.pallas import tpu as pltpu

LANE = 128        # vreg lane width
SUBLANE = 8       # f32 sublane count (accumulator granularity)
CHUNK_ROWS = 64   # rows folded per inner-loop step: (64,128) f32 = 8 vregs/stream


def _round_up(x: int, m: int) -> int:
    return (x + m - 1) // m * m


def _device_kind() -> str:
    try:
        return jax.devices()[0].device_kind.lower()
    except Exception:
        return ""


def _num_parallel_slices() -> int:
    # Only v7x has 2 TensorCores per chip. On 1-TC chips an extra grid slice
    # just costs one extra output flush + one duplicate (fully masked) block.
    # TODO(synk): switch the leading axis to pltpu.CORE_PARALLEL once its
    # behaviour on single-core chips is verified.
    return 2 if "7" in _device_kind() else 1


def _target_block_bytes() -> int:
    # Combined per-step input bytes (both streams). Pallas double-buffers, so
    # VMEM use is ~2x this plus a 12 KiB output block.
    kind = _device_kind()
    if "v6" in kind or "7" in kind:
        return 8 << 20   # 16 MiB of buffers: inside the 32 MiB default scoped VMEM
    return 4 << 20       # v5e & older: 8 MiB of buffers, inside the 16 MiB default


def _fbeta_sums_kernel(pred_ref, true_ref, out_ref, *,
                       rows_valid, row_tile, inner_steps, chunk_rows):
    """Fold this grid step's (row_tile, 128) slab into out_ref (1,3,8,128):
    partial sums of [true, sigmoid(pred)*true, sigmoid(pred)]."""
    c = pl.program_id(0)            # parallel slice (own TC on v7x)
    i = pl.program_id(1)            # sequential reduction step within the slice
    block_row0 = (c * inner_steps + i) * row_tile   # first global row of block

    @pl.when(i == 0)
    def _init():
        out_ref[...] = jnp.zeros_like(out_ref)

    n_chunks = row_tile // chunk_rows
    sub = chunk_rows // SUBLANE

    def accumulate(masked):
        # Stream the tile through vregs in (chunk_rows, 128) slices so the
        # full-tile p / t / p*t intermediates are never materialized (no VMEM
        # scratch spills, vld/vst slots stay near the ideal 2 loads per 8 rows).
        def body(k, carry):
            acc_t, acc_pt, acc_p = carry
            r0 = pl.multiple_of(k * chunk_rows, chunk_rows)
            x = pred_ref[pl.ds(r0, chunk_rows), :].astype(jnp.float32)
            t = true_ref[pl.ds(r0, chunk_rows), :].astype(jnp.float32)
            p = jax.nn.sigmoid(x)                 # f32 math, EUP-backed
            if masked:
                # Row-level mask: no flattened element index -> no int32
                # overflow for huge n; only the tail block pays for it.
                row = jax.lax.broadcasted_iota(jnp.int32, (chunk_rows, LANE), 0)
                valid = (block_row0 + r0 + row) < rows_valid
                # Keep this a select (not a multiply): out-of-bounds rows may
                # hold arbitrary garbage, including NaN/Inf.
                p = jnp.where(valid, p, 0.0)
                t = jnp.where(valid, t, 0.0)
            pt = p * t
            # Tile-aligned reshape + leading-axis sums: pure VPU adds, no XLU.
            acc_t = acc_t + t.reshape(sub, SUBLANE, LANE).sum(axis=0)
            acc_pt = acc_pt + pt.reshape(sub, SUBLANE, LANE).sum(axis=0)
            acc_p = acc_p + p.reshape(sub, SUBLANE, LANE).sum(axis=0)
            return acc_t, acc_pt, acc_p

        zero = jnp.zeros((SUBLANE, LANE), jnp.float32)
        acc_t, acc_pt, acc_p = jax.lax.fori_loop(
            0, n_chunks, body, (zero, zero, zero), unroll=min(4, n_chunks))
        out_ref[0, 0] += acc_t     # sum(true)
        out_ref[0, 1] += acc_pt    # sum(p * true)
        out_ref[0, 2] += acc_p     # sum(p)

    block_full = block_row0 + row_tile <= rows_valid

    @pl.when(block_full)
    def _hot():               # no masking work on full interior blocks
        accumulate(False)

    @pl.when(jnp.logical_not(block_full))
    def _tail():              # tail / clamped duplicate blocks
        accumulate(True)


def _fbeta_partial_sums(pred2d, true2d, *, max_rows_per_block=None):
    """Returns (ncores, 3, 8, 128) f32 partial sums of [t, p*t, p]."""
    rows = pred2d.shape[0]
    isz = pred2d.dtype.itemsize + true2d.dtype.itemsize

    # Dtype-scaled row tile: ~target bytes per step across both input streams.
    rt = _target_block_bytes() // (LANE * isz)
    rt = max(256, (rt // 256) * 256)
    if max_rows_per_block is not None:                      # testing hook
        rt = min(rt, _round_up(max_rows_per_block, CHUNK_ROWS))
    rt = min(rt, _round_up(rows, CHUNK_ROWS))               # shrink for small inputs
    chunk_rows = min(CHUNK_ROWS, rt)

    nblocks = pl.cdiv(rows, rt)
    slices = _num_parallel_slices()
    ncores = slices if nblocks >= slices else 1
    inner = pl.cdiv(nblocks, ncores)
    max_block = nblocks - 1

    def in_map(c, i):
        # Clamp so fully-masked trailing grid steps never index past the array.
        return (jnp.minimum(c * inner + i, max_block), 0)

    kernel = functools.partial(
        _fbeta_sums_kernel,
        rows_valid=rows, row_tile=rt, inner_steps=inner, chunk_rows=chunk_rows)

    n_elems = rows * LANE
    cost = pl.CostEstimate(
        flops=6 * n_elems,
        transcendentals=n_elems,
        bytes_accessed=n_elems * isz + ncores * 3 * SUBLANE * LANE * 4)

    return pl.pallas_call(
        kernel,
        out_shape=jax.ShapeDtypeStruct((ncores, 3, SUBLANE, LANE), jnp.float32),
        grid_spec=pltpu.PrefetchScalarGridSpec(
            num_scalar_prefetch=0,
            grid=(ncores, inner),
            in_specs=[
                pl.BlockSpec((rt, LANE), in_map),
                pl.BlockSpec((rt, LANE), in_map),
            ],
            out_specs=pl.BlockSpec((1, 3, SUBLANE, LANE), lambda c, i: (c, 0, 0, 0)),
        ),
        compiler_params=pltpu.CompilerParams(
            dimension_semantics=("parallel", "arbitrary"),
        ),
        cost_estimate=cost,
    )(pred2d, true2d)


def _fbeta_sums(pred, true, *, max_rows_per_block=None):
    """(3,) f32 totals: [sum(true), sum(sigmoid(pred)*true), sum(sigmoid(pred))]."""
    pred_f = pred.reshape(-1)
    true_f = true.reshape(-1)
    # Keep native dtypes on the HBM side (bf16 logits / int8 masks move 2-4x
    # fewer bytes than an f32 promotion). Only bool is converted (1B -> 1B).
    if pred_f.dtype == jnp.bool_:
        pred_f = pred_f.astype(jnp.int8)
    if true_f.dtype == jnp.bool_:
        true_f = true_f.astype(jnp.int8)

    n = pred_f.shape[0]
    rows = n // LANE
    n_full = rows * LANE

    sums = jnp.zeros((3,), jnp.float32)
    if rows > 0:
        if n_full == n:
            pred2d = pred_f.reshape(rows, LANE)       # free (bitcast) reshape
            true2d = true_f.reshape(rows, LANE)
        else:
            # 128-aligned prefix; the <128-element remainder is summed below in
            # plain jnp instead of padding (and copying) the whole array.
            pred2d = pred_f[:n_full].reshape(rows, LANE)
            true2d = true_f[:n_full].reshape(rows, LANE)
        partials = _fbeta_partial_sums(pred2d, true2d,
                                       max_rows_per_block=max_rows_per_block)
        sums = sums + partials.sum(axis=(0, 2, 3))
    if n_full != n:
        rem_p = jax.nn.sigmoid(pred_f[n_full:].astype(jnp.float32))
        rem_t = true_f[n_full:].astype(jnp.float32)
        sums = sums + jnp.stack([rem_t.sum(), (rem_p * rem_t).sum(), rem_p.sum()])
    return sums


def fbeta_loss(pred: jax.Array, true: jax.Array,
               smooth: float = 1e-6, beta: float = 0.5,
               *, max_rows_per_block=None) -> jax.Array:
    """JAX/Pallas equivalent of FBetaLoss.forward(pred, true)."""
    sums = _fbeta_sums(pred, true, max_rows_per_block=max_rows_per_block)
    y_true_count = sums[0]
    ctp = sums[1]
    pred_prob_sum = sums[2]
    cfp = pred_prob_sum - ctp                     # sum(p*(1-t)) derived

    beta_squared = beta * beta
    c_precision = ctp / (ctp + cfp + smooth)
    c_recall = ctp / (y_true_count + smooth)
    fbeta = ((1.0 + beta_squared) * (c_precision * c_recall)
             / (beta_squared * c_precision + c_recall + smooth))
    loss = 1.0 - fbeta

    # torch: `if true.sum() == 0 and pred_prob.sum() == 0: return 0.0`
    return jnp.where((y_true_count == 0.0) & (pred_prob_sum == 0.0),
                     jnp.float32(0.0), loss)


def _fbeta_loss_ref(pred, true, smooth=1e-6, beta=0.5):
    """Pure-JAX reference (mirrors the PyTorch code)."""
    pred_prob = jax.nn.sigmoid(pred.astype(jnp.float32))
    t = true.astype(jnp.float32)
    y_true_count = t.sum()
    ctp = (pred_prob * t).sum()
    cfp = (pred_prob * (1.0 - t)).sum()
    beta_squared = beta * beta
    c_precision = ctp / (ctp + cfp + smooth)
    c_recall = ctp / (y_true_count + smooth)
    fbeta = ((1.0 + beta_squared) * (c_precision * c_recall)
             / (beta_squared * c_precision + c_recall + smooth))
    return jnp.where((y_true_count == 0.0) & (pred_prob.sum() == 0.0),
                     jnp.float32(0.0), 1.0 - fbeta)


def _check(loss, ref, tag):
    loss = jax.block_until_ready(loss)
    ref = jax.block_until_ready(ref)
    assert jnp.allclose(loss, ref, atol=1e-5, rtol=1e-5), (tag, loss, ref)


if __name__ == "__main__":
    key = jax.random.PRNGKey(0)
    k1, k2, k3, k4, k5, k6, k7, k8 = jax.random.split(key, 8)

    # Case 1: aligned f32 logits / f32 mask (zero host-side copies).
    shape = (2, 4, 16, 16)
    pred = jax.random.normal(k1, shape, dtype=jnp.float32)
    true = (jax.random.uniform(k2, shape) > 0.5).astype(jnp.float32)
    _check(fbeta_loss(pred, true), _fbeta_loss_ref(pred, true), "aligned_f32")

    # Case 2: element count not a multiple of 128 (kernel prefix + jnp remainder).
    shape2 = (2, 3, 15, 17)
    pred2 = jax.random.normal(k3, shape2, dtype=jnp.float32)
    true2 = (jax.random.uniform(k4, shape2) > 0.5).astype(jnp.float32)
    _check(fbeta_loss(pred2, true2), _fbeta_loss_ref(pred2, true2), "unaligned")

    # Case 3: bf16 logits + boolean mask (mask stays 1 byte/element on the wire).
    pred3 = jax.random.normal(k5, shape, dtype=jnp.bfloat16)
    true3 = jax.random.uniform(k6, shape) > 0.5
    _check(fbeta_loss(pred3, true3), _fbeta_loss_ref(pred3, true3), "bf16_bool")

    # Case 4: multi-block grid (accumulation across sequential steps) via the
    # row-tile override, still at a small shape.
    shape4 = (2, 4, 32, 64)
    pred4 = jax.random.normal(k7, shape4, dtype=jnp.float32)
    true4 = (jax.random.uniform(k8, shape4) > 0.5).astype(jnp.float32)
    _check(fbeta_loss(pred4, true4, max_rows_per_block=64),
           _fbeta_loss_ref(pred4, true4), "multiblock")

    print("KERNEL_OK")
</pallas_src>

<mosaic_0001>
module attributes {stable_mosaic.version = 11 : i64} {
  func.func @_fbeta_sums_kernel(%arg0: i32, %arg1: i32, %arg2: memref<64x128xf32, #tpu.memory_space<vmem>>, %arg3: memref<64x128xf32, #tpu.memory_space<vmem>>, %arg4: memref<1x3x8x128xf32, #tpu.memory_space<vmem>>) attributes {dimension_semantics = [#tpu.dimension_semantics<parallel>, #tpu.dimension_semantics<arbitrary>], iteration_bounds = array<i64: 1, 1>, scalar_prefetch = 0 : i64, scratch_operands = 0 : i64, tpu.core_type = #tpu.core_type<tc>, window_params = [{transform_indices = @transform_0, window_bounds = array<i64: 64, 128>}, {transform_indices = @transform_1, window_bounds = array<i64: 64, 128>}, {transform_indices = @transform_2, window_bounds = array<i64: 1, 3, 8, 128>}]} {
    %c1_i32 = arith.constant 1 : i32
    %0 = arith.muli %arg0, %c1_i32 : i32
    %1 = arith.addi %0, %arg1 : i32
    %c64_i32 = arith.constant 64 : i32
    %2 = arith.muli %1, %c64_i32 : i32
    %c0_i32 = arith.constant 0 : i32
    %3 = arith.cmpi eq, %arg1, %c0_i32 : i32
    %4 = arith.extui %3 : i1 to i32
    %c0_i32_0 = arith.constant 0 : i32
    %5 = arith.cmpi ne, %4, %c0_i32_0 : i32
    scf.if %5 {
      %cst = arith.constant 0.000000e+00 : f32
      %13 = vector.broadcast %cst : f32 to vector<1x3x8x128xf32>
      %c0 = arith.constant 0 : index
      %c0_4 = arith.constant 0 : index
      %c0_5 = arith.constant 0 : index
      %c0_6 = arith.constant 0 : index
      %14 = vector.load %arg4[%c0, %c0_4, %c0_5, %c0_6] : memref<1x3x8x128xf32, #tpu.memory_space<vmem>>, vector<1x3x8x128xf32>
      tpu.vector_store %arg4[%c0, %c0_4, %c0_5, %c0_6], %13 {strides = array<i32>} : memref<1x3x8x128xf32, #tpu.memory_space<vmem>>, vector<1x3x8x128xf32>,
    } else {
    }
    %c64_i32_1 = arith.constant 64 : i32
    %6 = arith.addi %2, %c64_i32_1 : i32
    %c16_i32 = arith.constant 16 : i32
    %7 = arith.cmpi sle, %6, %c16_i32 : i32
    %8 = arith.extui %7 : i1 to i32
    %c0_i32_2 = arith.constant 0 : i32
    %9 = arith.cmpi ne, %8, %c0_i32_2 : i32
    scf.if %9 {
      %cst = arith.constant 0.000000e+00 : f32
      %13 = vector.broadcast %cst : f32 to vector<8x128xf32>
      %c0_i32_4 = arith.constant 0 : i32
      %c64_i32_5 = arith.constant 64 : i32
      %14 = arith.muli %c0_i32_4, %c64_i32_5 : i32
      %15 = tpu.assume_multiple %14, 64 : i32
      %16 = arith.index_cast %15 : i32 to index
      %c0 = arith.constant 0 : index
      %17 = vector.load %arg2[%16, %c0] : memref<64x128xf32, #tpu.memory_space<vmem>>, vector<64x128xf32>
      %18 = arith.index_cast %15 : i32 to index
      %c0_6 = arith.constant 0 : index
      %19 = vector.load %arg3[%18, %c0_6] : memref<64x128xf32, #tpu.memory_space<vmem>>, vector<64x128xf32>
      %20 = arith.negf %17 : vector<64x128xf32>
      %21 = math.exp %20 : vector<64x128xf32>
      %cst_7 = arith.constant 1.000000e+00 : f32
      %22 = vector.broadcast %cst_7 : f32 to vector<64x128xf32>
      %23 = arith.addf %22, %21 : vector<64x128xf32>
      %24 = arith.divf %22, %23 : vector<64x128xf32>
      %25 = arith.mulf %24, %19 : vector<64x128xf32>
      %26 = vector.shape_cast %19 : vector<64x128xf32> to vector<8x8x128xf32>
      %cst_8 = arith.constant dense<0.000000e+00> : vector<8x128xf32>
      %27 = vector.multi_reduction <add>, %26, %cst_8 [0] : vector<8x8x128xf32> to vector<8x128xf32>
      %28 = arith.addf %13, %27 : vector<8x128xf32>
      %29 = vector.shape_cast %25 : vector<64x128xf32> to vector<8x8x128xf32>
      %cst_9 = arith.constant dense<0.000000e+00> : vector<8x128xf32>
      %30 = vector.multi_reduction <add>, %29, %cst_9 [0] : vector<8x8x128xf32> to vector<8x128xf32>
      %31 = arith.addf %13, %30 : vector<8x128xf32>
      %32 = vector.shape_cast %24 : vector<64x128xf32> to vector<8x8x128xf32>
      %cst_10 = arith.constant dense<0.000000e+00> : vector<8x128xf32>
      %33 = vector.multi_reduction <add>, %32, %cst_10 [0] : vector<8x8x128xf32> to vector<8x128xf32>
      %34 = arith.addf %13, %33 : vector<8x128xf32>
      %c1_i32_11 = arith.constant 1 : i32
      %c0_12 = arith.constant 0 : index
      %c0_13 = arith.constant 0 : index
      %c0_14 = arith.constant 0 : index
      %c0_15 = arith.constant 0 : index
      %35 = vector.load %arg4[%c0_12, %c0_13, %c0_14, %c0_15] : memref<1x3x8x128xf32, #tpu.memory_space<vmem>>, vector<1x1x8x128xf32>
      %36 = vector.shape_cast %35 : vector<1x1x8x128xf32> to vector<8x128xf32>
      %37 = arith.addf %36, %28 : vector<8x128xf32>
      %c0_16 = arith.constant 0 : index
      %c0_17 = arith.constant 0 : index
      %c0_18 = arith.constant 0 : index
      %c0_19 = arith.constant 0 : index
      %38 = vector.load %arg4[%c0_16, %c0_17, %c0_18, %c0_19] : memref<1x3x8x128xf32, #tpu.memory_space<vmem>>, vector<1x1x8x128xf32>
      %39 = vector.shape_cast %38 : vector<1x1x8x128xf32> to vector<8x128xf32>
      %40 = vector.shape_cast %37 : vector<8x128xf32> to vector<1x1x8x128xf32>
      tpu.vector_store %arg4[%c0_16, %c0_17, %c0_18, %c0_19], %40 {strides = array<i32>} : memref<1x3x8x128xf32, #tpu.memory_space<vmem>>, vector<1x1x8x128xf32>,
      %c0_20 = arith.constant 0 : index
      %c1 = arith.constant 1 : index
      %c0_21 = arith.constant 0 : index
      %c0_22 = arith.constant 0 : index
      %41 = vector.load %arg4[%c0_20, %c1, %c0_21, %c0_22] : memref<1x3x8x128xf32, #tpu.memory_space<vmem>>, vector<1x1x8x128xf32>
      %42 = vector.shape_cast %41 : vector<1x1x8x128xf32> to vector<8x128xf32>
      %43 = arith.addf %42, %31 : vector<8x128xf32>
      %c0_23 = arith.constant 0 : index
      %c1_24 = arith.constant 1 : index
      %c0_25 = arith.constant 0 : index
      %c0_26 = arith.constant 0 : index
      %44 = vector.load %arg4[%c0_23, %c1_24, %c0_25, %c0_26] : memref<1x3x8x128xf32, #tpu.memory_space<vmem>>, vector<1x1x8x128xf32>
      %45 = vector.shape_cast %44 : vector<1x1x8x128xf32> to vector<8x128xf32>
      %46 = vector.shape_cast %43 : vector<8x128xf32> to vector<1x1x8x128xf32>
      tpu.vector_store %arg4[%c0_23, %c1_24, %c0_25, %c0_26], %46 {strides = array<i32>} : memref<1x3x8x128xf32, #tpu.memory_space<vmem>>, vector<1x1x8x128xf32>,
      %c0_27 = arith.constant 0 : index
      %c2 = arith.constant 2 : index
      %c0_28 = arith.constant 0 : index
      %c0_29 = arith.constant 0 : index
      %47 = vector.load %arg4[%c0_27, %c2, %c0_28, %c0_29] : memref<1x3x8x128xf32, #tpu.memory_space<vmem>>, vector<1x1x8x128xf32>
      %48 = vector.shape_cast %47 : vector<1x1x8x128xf32> to vector<8x128xf32>
      %49 = arith.addf %48, %34 : vector<8x128xf32>
      %c0_30 = arith.constant 0 : index
      %c2_31 = arith.constant 2 : index
      %c0_32 = arith.constant 0 : index
      %c0_33 = arith.constant 0 : index
      %50 = vector.load %arg4[%c0_30, %c2_31, %c0_32, %c0_33] : memref<1x3x8x128xf32, #tpu.memory_space<vmem>>, vector<1x1x8x128xf32>
      %51 = vector.shape_cast %50 : vector<1x1x8x128xf32> to vector<8x128xf32>
      %52 = vector.shape_cast %49 : vector<8x128xf32> to vector<1x1x8x128xf32>
      tpu.vector_store %arg4[%c0_30, %c2_31, %c0_32, %c0_33], %52 {strides = array<i32>} : memref<1x3x8x128xf32, #tpu.memory_space<vmem>>, vector<1x1x8x128xf32>,
    } else {
    }
    %true = arith.constant true
    %10 = arith.xori %7, %true : i1
    %11 = arith.extui %10 : i1 to i32
    %c0_i32_3 = arith.constant 0 : i32
    %12 = arith.cmpi ne, %11, %c0_i32_3 : i32
    scf.if %12 {
      %cst = arith.constant 0.000000e+00 : f32
      %13 = vector.broadcast %cst : f32 to vector<8x128xf32>
      %c0_i32_4 = arith.constant 0 : i32
      %c64_i32_5 = arith.constant 64 : i32
      %14 = arith.muli %c0_i32_4, %c64_i32_5 : i32
      %15 = tpu.assume_multiple %14, 64 : i32
      %16 = arith.index_cast %15 : i32 to index
      %c0 = arith.constant 0 : index
      %17 = vector.load %arg2[%16, %c0] : memref<64x128xf32, #tpu.memory_space<vmem>>, vector<64x128xf32>
      %18 = arith.index_cast %15 : i32 to index
      %c0_6 = arith.constant 0 : index
      %19 = vector.load %arg3[%18, %c0_6] : memref<64x128xf32, #tpu.memory_space<vmem>>, vector<64x128xf32>
      %20 = arith.negf %17 : vector<64x128xf32>
      %21 = math.exp %20 : vector<64x128xf32>
      %cst_7 = arith.constant 1.000000e+00 : f32
      %22 = vector.broadcast %cst_7 : f32 to vector<64x128xf32>
      %23 = arith.addf %22, %21 : vector<64x128xf32>
      %24 = arith.divf %22, %23 : vector<64x128xf32>
      %25 = tpu.iota {dimensions = array<i32: 0>} : vector<64x128xi32>
      %26 = arith.addi %2, %15 : i32
      %27 = vector.broadcast %26 : i32 to vector<64x128xi32>
      %28 = arith.addi %27, %25 : vector<64x128xi32>
      %c16_i32_8 = arith.constant 16 : i32
      %29 = vector.broadcast %c16_i32_8 : i32 to vector<64x128xi32>
      %30 = arith.cmpi slt, %28, %29 : vector<64x128xi32>
      %cst_9 = arith.constant 0.000000e+00 : f32
      %31 = vector.broadcast %cst_9 : f32 to vector<64x128xf32>
      %32 = arith.select %30, %24, %31 : vector<64x128xi1>, vector<64x128xf32>
      %cst_10 = arith.constant 0.000000e+00 : f32
      %33 = vector.broadcast %cst_10 : f32 to vector<64x128xf32>
      %34 = arith.select %30, %19, %33 : vector<64x128xi1>, vector<64x128xf32>
      %35 = arith.mulf %32, %34 : vector<64x128xf32>
      %36 = vector.shape_cast %34 : vector<64x128xf32> to vector<8x8x128xf32>
      %cst_11 = arith.constant dense<0.000000e+00> : vector<8x128xf32>
      %37 = vector.multi_reduction <add>, %36, %cst_11 [0] : vector<8x8x128xf32> to vector<8x128xf32>
      %38 = arith.addf %13, %37 : vector<8x128xf32>
      %39 = vector.shape_cast %35 : vector<64x128xf32> to vector<8x8x128xf32>
      %cst_12 = arith.constant dense<0.000000e+00> : vector<8x128xf32>
      %40 = vector.multi_reduction <add>, %39, %cst_12 [0] : vector<8x8x128xf32> to vector<8x128xf32>
      %41 = arith.addf %13, %40 : vector<8x128xf32>
      %42 = vector.shape_cast %32 : vector<64x128xf32> to vector<8x8x128xf32>
      %cst_13 = arith.constant dense<0.000000e+00> : vector<8x128xf32>
      %43 = vector.multi_reduction <add>, %42, %cst_13 [0] : vector<8x8x128xf32> to vector<8x128xf32>
      %44 = arith.addf %13, %43 : vector<8x128xf32>
      %c1_i32_14 = arith.constant 1 : i32
      %c0_15 = arith.constant 0 : index
      %c0_16 = arith.constant 0 : index
      %c0_17 = arith.constant 0 : index
      %c0_18 = arith.constant 0 : index
      %45 = vector.load %arg4[%c0_15, %c0_16, %c0_17, %c0_18] : memref<1x3x8x128xf32, #tpu.memory_space<vmem>>, vector<1x1x8x128xf32>
      %46 = vector.shape_cast %45 : vector<1x1x8x128xf32> to vector<8x128xf32>
      %47 = arith.addf %46, %38 : vector<8x128xf32>
      %c0_19 = arith.constant 0 : index
      %c0_20 = arith.constant 0 : index
      %c0_21 = arith.constant 0 : index
      %c0_22 = arith.constant 0 : index
      %48 = vector.load %arg4[%c0_19, %c0_20, %c0_21, %c0_22] : memref<1x3x8x128xf32, #tpu.memory_space<vmem>>, vector<1x1x8x128xf32>
      %49 = vector.shape_cast %48 : vector<1x1x8x128xf32> to vector<8x128xf32>
      %50 = vector.shape_cast %47 : vector<8x128xf32> to vector<1x1x8x128xf32>
      tpu.vector_store %arg4[%c0_19, %c0_20, %c0_21, %c0_22], %50 {strides = array<i32>} : memref<1x3x8x128xf32, #tpu.memory_space<vmem>>, vector<1x1x8x128xf32>,
      %c0_23 = arith.constant 0 : index
      %c1 = arith.constant 1 : index
      %c0_24 = arith.constant 0 : index
      %c0_25 = arith.constant 0 : index
      %51 = vector.load %arg4[%c0_23, %c1, %c0_24, %c0_25] : memref<1x3x8x128xf32, #tpu.memory_space<vmem>>, vector<1x1x8x128xf32>
      %52 = vector.shape_cast %51 : vector<1x1x8x128xf32> to vector<8x128xf32>
      %53 = arith.addf %52, %41 : vector<8x128xf32>
      %c0_26 = arith.constant 0 : index
      %c1_27 = arith.constant 1 : index
      %c0_28 = arith.constant 0 : index
      %c0_29 = arith.constant 0 : index
      %54 = vector.load %arg4[%c0_26, %c1_27, %c0_28, %c0_29] : memref<1x3x8x128xf32, #tpu.memory_space<vmem>>, vector<1x1x8x128xf32>
      %55 = vector.shape_cast %54 : vector<1x1x8x128xf32> to vector<8x128xf32>
      %56 = vector.shape_cast %53 : vector<8x128xf32> to vector<1x1x8x128xf32>
      tpu.vector_store %arg4[%c0_26, %c1_27, %c0_28, %c0_29], %56 {strides = array<i32>} : memref<1x3x8x128xf32, #tpu.memory_space<vmem>>, vector<1x1x8x128xf32>,
      %c0_30 = arith.constant 0 : index
      %c2 = arith.constant 2 : index
      %c0_31 = arith.constant 0 : index
      %c0_32 = arith.constant 0 : index
      %57 = vector.load %arg4[%c0_30, %c2, %c0_31, %c0_32] : memref<1x3x8x128xf32, #tpu.memory_space<vmem>>, vector<1x1x8x128xf32>
      %58 = vector.shape_cast %57 : vector<1x1x8x128xf32> to vector<8x128xf32>
      %59 = arith.addf %58, %44 : vector<8x128xf32>
      %c0_33 = arith.constant 0 : index
      %c2_34 = arith.constant 2 : index
      %c0_35 = arith.constant 0 : index
      %c0_36 = arith.constant 0 : index
      %60 = vector.load %arg4[%c0_33, %c2_34, %c0_35, %c0_36] : memref<1x3x8x128xf32, #tpu.memory_space<vmem>>, vector<1x1x8x128xf32>
      %61 = vector.shape_cast %60 : vector<1x1x8x128xf32> to vector<8x128xf32>
      %62 = vector.shape_cast %59 : vector<8x128xf32> to vector<1x1x8x128xf32>
      tpu.vector_store %arg4[%c0_33, %c2_34, %c0_35, %c0_36], %62 {strides = array<i32>} : memref<1x3x8x128xf32, #tpu.memory_space<vmem>>, vector<1x1x8x128xf32>,
    } else {
    }
    return
  }
  func.func @transform_0(%arg0: i32, %arg1: i32) -> (i32, i32) {
    %c1_i32 = arith.constant 1 : i32
    %0 = arith.muli %arg0, %c1_i32 : i32
    %1 = arith.addi %0, %arg1 : i32
    %c0_i32 = arith.constant 0 : i32
    %2 = arith.minsi %1, %c0_i32 : i32
    %c0_i32_0 = arith.constant 0 : i32
    %c0_i32_1 = arith.constant 0 : i32
    return %2, %c0_i32_0 : i32, i32
  }
  func.func @transform_1(%arg0: i32, %arg1: i32) -> (i32, i32) {
    %c1_i32 = arith.constant 1 : i32
    %0 = arith.muli %arg0, %c1_i32 : i32
    %1 = arith.addi %0, %arg1 : i32
    %c0_i32 = arith.constant 0 : i32
    %2 = arith.minsi %1, %c0_i32 : i32
    %c0_i32_0 = arith.constant 0 : i32
    %c0_i32_1 = arith.constant 0 : i32
    return %2, %c0_i32_0 : i32, i32
  }
  func.func @transform_2(%arg0: i32, %arg1: i32) -> (i32, i32, i32, i32) {
    %c0_i32 = arith.constant 0 : i32
    %c0_i32_0 = arith.constant 0 : i32
    %c0_i32_1 = arith.constant 0 : i32
    %c0_i32_2 = arith.constant 0 : i32
    return %arg0, %c0_i32, %c0_i32_0, %c0_i32_1 : i32, i32, i32, i32
  }
}

</mosaic_0001>

<bundles_post_ra>
// kernel: tpu_custom_call.1
= control target key start
LH: loop header
LB: loop body
LE: loop exit
PB: predicated region body
PF: predicated region fallthrough
CT: control target
= control target key end

     0   :  { %7 = vsyncpa [#allocation3], 0  ;;  %s536_s0 = inlined_call_operand.hbm [shape: f32[16,128], index: 0, kind: input, shape index: {}]   ;;  %s537_s1 = inlined_call_operand.hbm [shape: f32[16,128], index: 1, kind: input, shape index: {}]   ;;  %s538_s2 = inlined_call_operand.hbm [shape: f32[1,3,8,128], index: 2, kind: output, shape index: {}]  }
   0x1   :  { %8 = vsyncpa [#allocation6], 0 }
   0x2   :  { %9 = vsyncpa [#allocation4], 0 }
   0x3   :  { %20 = vsyncadd [#allocation3], 768  ;;  %s471_s9 = smov [#allocation2]   ;;  %s399_s13 = scalar_lea.hbm %s536_s0, 256 }
   0x4   :  { %s25_s10 = sshll.u32 %s471_s9, 4  ;;  %p400_p0 = scmp.ne.s32.totalorder %s536_s0, %s399_s13  ;;  %s26_s10 = int_to_ptr.vmem [resolvable:$true] %s25_s10 }
   0x5   :  { %p403_p1 = scmp.lt.u32.totalorder %s399_s13, %s536_s0 }
   0x7   :  { %p405_p2 = pnand %p403_p1, %p400_p0 }
   0x9   :  { %408 = shalt.err (!%p405_p2)
}
   0xa   :  { %s409_s18 = scalar_lea.vmem %s26_s10, 256  ;;  %s413_s19 = scalar_lea.vmem %s26_s10, 1024 }
   0xb   :  { %p410_p3 = scmp.ne.s32.totalorder %s26_s10, %s409_s18  ;;  %p414_p4 = scmp.lt.s32.totalorder %s26_s10, %s26_s10 }
   0xc   :  { %p415_p5 = scmp.lt.s32.totalorder %s413_s19, %s409_s18 }
   0xe   :  { %p416_p6 = por %p415_p5, %p414_p4 }
  0x10   :  { %p417_p7 = pnand %p416_p6, %p410_p3 }
  0x12   :  { %420 = shalt.err (!%p417_p7)
}
  0x13   :  { %s472_s20 = smov 128   ;;  %s473_s21 = smov 8  }
  0x14   :  { %31 = dma.hbm_to_vmem [thread:$0]  %s536_s0, 256, %s26_s10, [#allocation3], %s472_s20, %s472_s20, %s473_s21  }
  0x15   :  { %42 = vsyncadd [#allocation6], 768  ;;  %s474_s24 = smov [#allocation5]   ;;  %s421_s28 = scalar_lea.hbm %s537_s1, 256 }
  0x16   :  { %s47_s25 = sshll.u32 %s474_s24, 4  ;;  %p422_p8 = scmp.ne.s32.totalorder %s537_s1, %s421_s28  ;;  %s48_s25 = int_to_ptr.vmem [resolvable:$true] %s47_s25 }
  0x17   :  { %p425_p9 = scmp.lt.u32.totalorder %s421_s28, %s537_s1 }
  0x19   :  { %p427_p10 = pnand %p425_p9, %p422_p8 }
  0x1b   :  { %430 = shalt.err (!%p427_p10)
}
  0x1c   :  { %s431_s5 = scalar_lea.vmem %s48_s25, 256  ;;  %s435_s0 = scalar_lea.vmem %s48_s25, 1024 }
  0x1d   :  { %p432_p11 = scmp.ne.s32.totalorder %s48_s25, %s431_s5  ;;  %p436_p12 = scmp.lt.s32.totalorder %s48_s25, %s48_s25 }
  0x1e   :  { %p437_p13 = scmp.lt.s32.totalorder %s435_s0, %s431_s5 }
  0x20   :  { %p438_p0 = por %p437_p13, %p436_p12 }
  0x22   :  { %p439_p1 = pnand %p438_p0, %p432_p11 }
  0x24   :  { %442 = shalt.err (!%p439_p1)
}
  0x25   :  { %53 = dma.hbm_to_vmem [thread:$0]  %s537_s1, 256, %s48_s25, [#allocation6], %s472_s20, %s472_s20, %s473_s21  }
  0x26   :  { %465 = dma.done.wait [#allocation3], 1024  }
  0x27   :  { %466 = vsyncadd [#allocation3], 4294966272 }
  0x28   :  { %467 = dma.done.wait [#allocation6], 1024  }
  0x29   :  { %468 = vsyncadd [#allocation6], 4294966272  ;;  %v205_v0 = vld [vmem:[#allocation5] sm:$0xff]  ;;  %v206_v1 = vld [vmem:[#allocation5 + $0x8] sm:$0xff]  ;;  %s475_s1 = smov [#allocation7]  }
  0x2a   :  { %v197_v2 = vld [vmem:[#allocation2] sm:$0xff]  ;;  %v312_v3 = vadd.f32 %v206_v1, %v205_v0  ;;  %v198_v4 = vld [vmem:[#allocation2 + $0x8] sm:$0xff]  ;;  %s352_s8 = sshll.u32 %s475_s1, 4  ;;  %s353_s8 = int_to_ptr.vmem [resolvable:$true] %s352_s8 }
  0x2b   :  { %v377_v5 = vmul.f32 -1.442695, %v197_v2  ;;  %v378_v6 = vmul.f32 -1.442695, %v198_v4  ;;  %s443_s9 = scalar_lea.vmem %s353_s8, 384  ;;  %p448_p3 = scmp.lt.s32.totalorder %s353_s8, %s353_s8 }
  0x2c   :  { %338 = vst [vmem:[#allocation7] sm:$0xff] %v312_v3  ;;  %p444_p2 = scmp.ne.s32.totalorder %s353_s8, %s443_s9  ;;  %p449_p4 = scmp.lt.s32.totalorder %s443_s9, %s443_s9 }
  0x2d   :  { %391 = vpow2.f32 %v377_v5 }
  0x2e   :  { %393 = vpow2.f32 %v378_v6  ;;  %p450_p5 = por %p449_p4, %p448_p3 }
  0x30   :  { %p451_p6 = pnand %p450_p5, %p444_p2 }
  0x37   :  { %v392_v7 = vpop.eup %391 }
  0x38   :  { %v394_v8 = vpop.eup %393  ;;  %v237_v9 = vadd.f32 1.0, %v392_v7 }
  0x39   :  { %v238_v10 = vadd.f32 1.0, %v394_v8 }
  0x3a   :  { %395 = vrcp.f32 %v237_v9 }
  0x3b   :  { %397 = vrcp.f32 %v238_v10 }
  0x44   :  { %v396_v11 = vpop.eup %395 }
  0x45   :  { %v398_v12 = vpop.eup %397  ;;  %v304_v13 = vmul.f32 %v396_v11, %v205_v0 }
  0x46   :  { %v305_v14 = vmul.f32 %v398_v12, %v206_v1  ;;  %v328_v15 = vadd.f32 %v398_v12, %v396_v11 }
  0x48   :  { %v320_v16 = vadd.f32 %v305_v14, %v304_v13  ;;  %346 = vst [vmem:[#allocation7 + $0x10] sm:$0xff] %v328_v15 }
  0x4a   :  { %342 = vst [vmem:[#allocation7 + $0x8] sm:$0xff] %v320_v16 }
  0x4b   :  { %454 = shalt.err (!%p451_p6)
}
  0x4c   :  { %s455_s12 = scalar_lea.hbm %s538_s2, 384 }
  0x4d   :  { %p456_p7 = scmp.ne.s32.totalorder %s538_s2, %s455_s12  ;;  %p459_p8 = scmp.lt.u32.totalorder %s455_s12, %s538_s2 }
  0x4f   :  { %p461_p9 = pnand %p459_p8, %p456_p7 }
  0x51   :  { %464 = shalt.err (!%p461_p9)
}
  0x52   :  { %358 = dma.vmem_to_hbm [thread:$0]  %s353_s8, 384, %s538_s2, [#allocation4], %s472_s20, %s472_s20, %s473_s21  }
  0x53   :  { %469 = dma.done.wait [#allocation4], 384  }
  0x54   :  { %470 = vsyncadd [#allocation4], 4294966912 }
  0x55   :  { %362 = vsyncpa [#allocation3], 1 }
  0x56   :  { %363 = vsyncpa [#allocation6], 1 }
  0x57   :  { %364 = vsyncpa [#allocation4], 1 }

</bundles_post_ra>
